<compile_context>
chip_gen: v6e
topology: v6e:2x2x1
jax: 0.10.0
libtpu: 0.0.40
codegen_flags: <defaults>
</compile_context>

<pallas_src>
import functools

import jax
import jax.numpy as jnp
from jax.experimental import pallas as pl
from jax.experimental.pallas import tpu as pltpu


_LANE = 128
_LANE_TILE_TARGET = 512                 # lane width per block (multiple of 128)
_ROW_BLOCK_BYTES = 2 * 1024 * 1024      # ~2 MiB per (block_n, block_d) buffer
_VMEM_LIMIT_BYTES = 32 * 1024 * 1024    # safe on v5e/v6e (128 MiB) and v7x (64 MiB)


def _round_up(x: int, m: int) -> int:
    return (x + m - 1) // m * m


# ---------------------------------------------------------------------------
# Pass 1: per-column statistics (running sum / sum-of-squares -> shift/scale).
# Output blocks are revisited across the row (reduction) axis, so they stay
# resident in VMEM and act as accumulators (init/finalize via pl.when).
# ---------------------------------------------------------------------------
def _stats_kernel(x_ref, shift_ref, scale_ref, *, method: str, n_rows: int):
    ri = pl.program_id(1)                      # row (reduction) axis, last in grid

    @pl.when(ri == 0)
    def _init():
        shift_ref[...] = jnp.zeros_like(shift_ref)   # running sum(x)
        scale_ref[...] = jnp.zeros_like(scale_ref)   # running sum(x*x)

    x = x_ref[...].astype(jnp.float32)         # (block_n, block_d)
    shift_ref[...] += jnp.sum(x, axis=0, keepdims=True)
    if method != "mean":
        scale_ref[...] += jnp.sum(x * x, axis=0, keepdims=True)

    @pl.when(ri == pl.num_programs(1) - 1)
    def _finalize():
        mean = shift_ref[...] * (1.0 / n_rows)
        if method == "mean":
            shift_ref[...] = mean
            scale_ref[...] = jnp.ones_like(scale_ref)
        else:
            # torch.std default is unbiased (ddof=1); n_rows == 1 -> NaN, like torch.
            inv_nm1 = 1.0 / (n_rows - 1) if n_rows > 1 else float("nan")
            var = (scale_ref[...] - n_rows * (mean * mean)) * inv_nm1
            var = jnp.maximum(var, 0.0)        # guard tiny negative rounding
            scale_ref[...] = jax.lax.rsqrt(var)      # 1/std, computed once per column
            if method == "mean+std":
                shift_ref[...] = mean
            else:  # "std": divide only, no centering
                shift_ref[...] = jnp.zeros_like(shift_ref)


# ---------------------------------------------------------------------------
# Pass 2: apply  out = (x - shift) * scale   (broadcast over rows).
# ---------------------------------------------------------------------------
def _apply_kernel(x_ref, shift_ref, scale_ref, o_ref):
    x = x_ref[...].astype(jnp.float32)
    o_ref[...] = ((x - shift_ref[...]) * scale_ref[...]).astype(o_ref.dtype)


def pallas_normalize(data: jax.Array, method: str, *, inplace: bool = False) -> jax.Array:
    """Functional equivalent of EmbeddingAdaptor._normalize (returns new array).

    If inplace=True, the (possibly padded) input buffer is donated to the
    output via input_output_aliases, mirroring the in-place torch update.
    """
    if method not in ("mean+std", "mean", "std"):
        raise ValueError(f"Unrecognized normalize method: {method}")
    if data.ndim != 2:
        raise ValueError(f"expected a 2-D embedding table, got {data.shape}")

    n, d = data.shape
    itemsize = jnp.dtype(data.dtype).itemsize

    # --- lane (column) tiling: lane-dense, >= 2 column blocks when possible ---
    d_pad = _round_up(d, _LANE)
    block_d = min(_LANE_TILE_TARGET, d_pad)
    if d_pad > _LANE and d_pad // block_d < 2:
        block_d = max(_LANE, (d_pad // 2) // _LANE * _LANE)   # keep both v7x TCs busy
    d_pad = _round_up(d_pad, block_d)

    # --- row tiling: VMEM footprint independent of vocab size N ---
    row_mult = max(8, 32 // itemsize)   # sublane packing (8 f32 / 16 bf16 / 32 i8)
    max_rows = max(row_mult,
                   (_ROW_BLOCK_BYTES // (block_d * itemsize)) // row_mult * row_mult)
    block_n = min(_round_up(n, row_mult), max_rows)
    n_pad = _round_up(n, block_n)

    x = data
    if (n_pad, d_pad) != (n, d):
        # Zero padding leaves sum / sum-of-squares untouched (we divide by the
        # true n), so no masking is needed in the reduction.
        x = jnp.pad(x, ((0, n_pad - n), (0, d_pad - d)))

    grid_cols = d_pad // block_d
    grid_rows = n_pad // block_n

    # ------------------------------ pass 1: stats ------------------------------
    shift, scale = pl.pallas_call(
        functools.partial(_stats_kernel, method=method, n_rows=n),
        out_shape=(
            jax.ShapeDtypeStruct((1, d_pad), jnp.float32),
            jax.ShapeDtypeStruct((1, d_pad), jnp.float32),
        ),
        grid_spec=pltpu.PrefetchScalarGridSpec(
            num_scalar_prefetch=0,
            grid=(grid_cols, grid_rows),            # reduction axis last
            in_specs=[pl.BlockSpec((block_n, block_d), lambda j, i: (i, j))],
            out_specs=(
                pl.BlockSpec((1, block_d), lambda j, i: (0, j)),
                pl.BlockSpec((1, block_d), lambda j, i: (0, j)),
            ),
        ),
        compiler_params=pltpu.CompilerParams(
            dimension_semantics=("parallel", "arbitrary"),
            vmem_limit_bytes=_VMEM_LIMIT_BYTES,
        ),
        cost_estimate=pl.CostEstimate(
            flops=int(3 * n * d),
            transcendentals=int(d),
            bytes_accessed=int(n * d * itemsize + 2 * d * 4),
        ),
    )(x)

    # ------------------------------ pass 2: apply ------------------------------
    alias = {"input_output_aliases": {0: 0}} if inplace else {}
    out = pl.pallas_call(
        _apply_kernel,
        out_shape=jax.ShapeDtypeStruct((n_pad, d_pad), data.dtype),
        grid_spec=pltpu.PrefetchScalarGridSpec(
            num_scalar_prefetch=0,
            grid=(grid_cols, grid_rows),
            in_specs=[
                pl.BlockSpec((block_n, block_d), lambda j, i: (i, j)),
                pl.BlockSpec((1, block_d), lambda j, i: (0, j)),
                pl.BlockSpec((1, block_d), lambda j, i: (0, j)),
            ],
            out_specs=pl.BlockSpec((block_n, block_d), lambda j, i: (i, j)),
        ),
        compiler_params=pltpu.CompilerParams(
            dimension_semantics=("parallel", "parallel"),
            vmem_limit_bytes=_VMEM_LIMIT_BYTES,
        ),
        cost_estimate=pl.CostEstimate(
            flops=int(2 * n * d),
            transcendentals=0,
            bytes_accessed=int(2 * n * d * itemsize),
        ),
        **alias,
    )(x, shift, scale)

    if (n_pad, d_pad) != (n, d):
        out = out[:n, :d]
    return out


def _reference_normalize(data, method):
    mean = jnp.mean(data, axis=0, keepdims=True)
    std = jnp.std(data, axis=0, keepdims=True, ddof=1)
    if method == "mean+std":
        return (data - mean) / std
    if method == "mean":
        return data - mean
    if method == "std":
        return data / std
    raise ValueError(method)


if __name__ == "__main__":
    # Deterministic synthetic "embedding table": vocab=64, embed_size=256.
    key = jax.random.PRNGKey(0)
    data = jax.random.normal(key, (64, 256), dtype=jnp.float32) * 2.0 + 0.5

    # TODO(synk): EmbeddingAdaptor.forward is abstract (NotImplementedError);
    # only the concrete `_normalize` compute is implemented as a kernel.
    for method in ("mean+std", "mean", "std"):
        out = jax.block_until_ready(pallas_normalize(data, method))
        ref = _reference_normalize(data, method)
        assert jnp.allclose(out, ref, rtol=1e-3, atol=1e-4), method

    # In-place variant (donates its input buffer, mirroring torch's in-place update).
    scratch = data + 0.0
    out_ip = jax.block_until_ready(pallas_normalize(scratch, "mean+std", inplace=True))
    assert jnp.allclose(out_ip, _reference_normalize(data, "mean+std"), rtol=1e-3, atol=1e-4)

    print("KERNEL_OK")
</pallas_src>

<mosaic_0001>
module attributes {stable_mosaic.version = 11 : i64} {
  func.func @_stats_kernel(%arg0: i32, %arg1: i32, %arg2: memref<64x128xf32, #tpu.memory_space<vmem>>, %arg3: memref<1x128xf32, #tpu.memory_space<vmem>>, %arg4: memref<1x128xf32, #tpu.memory_space<vmem>>) attributes {dimension_semantics = [#tpu.dimension_semantics<parallel>, #tpu.dimension_semantics<arbitrary>], iteration_bounds = array<i64: 2, 1>, scalar_prefetch = 0 : i64, scratch_operands = 0 : i64, tpu.core_type = #tpu.core_type<tc>, window_params = [{transform_indices = @transform_0, window_bounds = array<i64: 64, 128>}, {transform_indices = @transform_1, window_bounds = array<i64: 1, 128>}, {transform_indices = @transform_2, window_bounds = array<i64: 1, 128>}]} {
    %c0_i32 = arith.constant 0 : i32
    %0 = arith.cmpi eq, %arg1, %c0_i32 : i32
    %1 = arith.extui %0 : i1 to i32
    %c0_i32_0 = arith.constant 0 : i32
    %2 = arith.cmpi ne, %1, %c0_i32_0 : i32
    scf.if %2 {
      %cst_13 = arith.constant 0.000000e+00 : f32
      %18 = vector.broadcast %cst_13 : f32 to vector<1x128xf32>
      %c0_14 = arith.constant 0 : index
      %c0_15 = arith.constant 0 : index
      %19 = vector.load %arg3[%c0_14, %c0_15] : memref<1x128xf32, #tpu.memory_space<vmem>>, vector<1x128xf32>
      tpu.vector_store %arg3[%c0_14, %c0_15], %18 {strides = array<i32>} : memref<1x128xf32, #tpu.memory_space<vmem>>, vector<1x128xf32>,
      %cst_16 = arith.constant 0.000000e+00 : f32
      %20 = vector.broadcast %cst_16 : f32 to vector<1x128xf32>
      %c0_17 = arith.constant 0 : index
      %c0_18 = arith.constant 0 : index
      %21 = vector.load %arg4[%c0_17, %c0_18] : memref<1x128xf32, #tpu.memory_space<vmem>>, vector<1x128xf32>
      tpu.vector_store %arg4[%c0_17, %c0_18], %20 {strides = array<i32>} : memref<1x128xf32, #tpu.memory_space<vmem>>, vector<1x128xf32>,
    } else {
    }
    %c0 = arith.constant 0 : index
    %c0_1 = arith.constant 0 : index
    %3 = vector.load %arg2[%c0, %c0_1] : memref<64x128xf32, #tpu.memory_space<vmem>>, vector<64x128xf32>
    %c0_2 = arith.constant 0 : index
    %c0_3 = arith.constant 0 : index
    %4 = vector.load %arg3[%c0_2, %c0_3] : memref<1x128xf32, #tpu.memory_space<vmem>>, vector<1x128xf32>
    %cst = arith.constant dense<0.000000e+00> : vector<128xf32>
    %5 = vector.multi_reduction <add>, %3, %cst [0] : vector<64x128xf32> to vector<128xf32>
    %6 = vector.shape_cast %5 : vector<128xf32> to vector<1x128xf32>
    %7 = arith.addf %4, %6 : vector<1x128xf32>
    %c0_4 = arith.constant 0 : index
    %c0_5 = arith.constant 0 : index
    %8 = vector.load %arg3[%c0_4, %c0_5] : memref<1x128xf32, #tpu.memory_space<vmem>>, vector<1x128xf32>
    tpu.vector_store %arg3[%c0_4, %c0_5], %7 {strides = array<i32>} : memref<1x128xf32, #tpu.memory_space<vmem>>, vector<1x128xf32>,
    %c0_6 = arith.constant 0 : index
    %c0_7 = arith.constant 0 : index
    %9 = vector.load %arg4[%c0_6, %c0_7] : memref<1x128xf32, #tpu.memory_space<vmem>>, vector<1x128xf32>
    %10 = arith.mulf %3, %3 : vector<64x128xf32>
    %cst_8 = arith.constant dense<0.000000e+00> : vector<128xf32>
    %11 = vector.multi_reduction <add>, %10, %cst_8 [0] : vector<64x128xf32> to vector<128xf32>
    %12 = vector.shape_cast %11 : vector<128xf32> to vector<1x128xf32>
    %13 = arith.addf %9, %12 : vector<1x128xf32>
    %c0_9 = arith.constant 0 : index
    %c0_10 = arith.constant 0 : index
    %14 = vector.load %arg4[%c0_9, %c0_10] : memref<1x128xf32, #tpu.memory_space<vmem>>, vector<1x128xf32>
    tpu.vector_store %arg4[%c0_9, %c0_10], %13 {strides = array<i32>} : memref<1x128xf32, #tpu.memory_space<vmem>>, vector<1x128xf32>,
    %c0_i32_11 = arith.constant 0 : i32
    %15 = arith.cmpi eq, %arg1, %c0_i32_11 : i32
    %16 = arith.extui %15 : i1 to i32
    %c0_i32_12 = arith.constant 0 : i32
    %17 = arith.cmpi ne, %16, %c0_i32_12 : i32
    scf.if %17 {
      %c0_13 = arith.constant 0 : index
      %c0_14 = arith.constant 0 : index
      %18 = vector.load %arg3[%c0_13, %c0_14] : memref<1x128xf32, #tpu.memory_space<vmem>>, vector<1x128xf32>
      %cst_15 = arith.constant 1.562500e-02 : f32
      %19 = vector.broadcast %cst_15 : f32 to vector<1x128xf32>
      %20 = arith.mulf %18, %19 : vector<1x128xf32>
      %c0_16 = arith.constant 0 : index
      %c0_17 = arith.constant 0 : index
      %21 = vector.load %arg4[%c0_16, %c0_17] : memref<1x128xf32, #tpu.memory_space<vmem>>, vector<1x128xf32>
      %22 = arith.mulf %20, %20 : vector<1x128xf32>
      %cst_18 = arith.constant 6.400000e+01 : f32
      %23 = vector.broadcast %cst_18 : f32 to vector<1x128xf32>
      %24 = arith.mulf %23, %22 : vector<1x128xf32>
      %25 = arith.subf %21, %24 : vector<1x128xf32>
      %cst_19 = arith.constant 0.0158730168 : f32
      %26 = vector.broadcast %cst_19 : f32 to vector<1x128xf32>
      %27 = arith.mulf %25, %26 : vector<1x128xf32>
      %cst_20 = arith.constant 0.000000e+00 : f32
      %28 = vector.broadcast %cst_20 : f32 to vector<1x128xf32>
      %29 = arith.maximumf %27, %28 : vector<1x128xf32>
      %30 = math.rsqrt %29 : vector<1x128xf32>
      %c0_21 = arith.constant 0 : index
      %c0_22 = arith.constant 0 : index
      %31 = vector.load %arg4[%c0_21, %c0_22] : memref<1x128xf32, #tpu.memory_space<vmem>>, vector<1x128xf32>
      tpu.vector_store %arg4[%c0_21, %c0_22], %30 {strides = array<i32>} : memref<1x128xf32, #tpu.memory_space<vmem>>, vector<1x128xf32>,
      %c0_23 = arith.constant 0 : index
      %c0_24 = arith.constant 0 : index
      %32 = vector.load %arg3[%c0_23, %c0_24] : memref<1x128xf32, #tpu.memory_space<vmem>>, vector<1x128xf32>
      tpu.vector_store %arg3[%c0_23, %c0_24], %20 {strides = array<i32>} : memref<1x128xf32, #tpu.memory_space<vmem>>, vector<1x128xf32>,
    } else {
    }
    return
  }
  func.func @transform_0(%arg0: i32, %arg1: i32) -> (i32, i32) {
    %c0_i32 = arith.constant 0 : i32
    return %arg1, %arg0 : i32, i32
  }
  func.func @transform_1(%arg0: i32, %arg1: i32) -> (i32, i32) {
    %c0_i32 = arith.constant 0 : i32
    %c0_i32_0 = arith.constant 0 : i32
    return %c0_i32, %arg0 : i32, i32
  }
  func.func @transform_2(%arg0: i32, %arg1: i32) -> (i32, i32) {
    %c0_i32 = arith.constant 0 : i32
    %c0_i32_0 = arith.constant 0 : i32
    return %c0_i32, %arg0 : i32, i32
  }
}

</mosaic_0001>

<bundles_post_ra>
// kernel: tpu_custom_call.1
= control target key start
LH: loop header
LB: loop body
LE: loop exit
PB: predicated region body
PF: predicated region fallthrough
CT: control target
= control target key end

     0   :  { %8 = vsyncpa [#allocation3], 0  ;;  %s833_s0 = inlined_call_operand.hbm [shape: f32[64,256], index: 0, kind: input, shape index: {}]   ;;  %s834_s1 = inlined_call_operand.hbm [shape: f32[1,256], index: 1, kind: output, shape index: {0}]   ;;  %s835_s2 = inlined_call_operand.hbm [shape: f32[1,256], index: 2, kind: output, shape index: {1}]  }
   0x1   :  { %10 = vsyncpa [#allocation3 + $0x1], 0 }
   0x2   :  { %11 = vsyncpa [#allocation4], 0 }
   0x3   :  { %13 = vsyncpa [#allocation4 + $0x1], 0 }
   0x4   :  { %14 = vsyncpa [#allocation7], 0 }
   0x5   :  { %16 = vsyncpa [#allocation7 + $0x1], 0  ;;  %s637_s9 = smov 0   ;;  %s639_s10 = smov 0  }
   0x6   :  { %s641_s11 = smov 0   ;;  %s643_s12 = smov 0  }
   0x7   :  { %s645_s13 = smov 0   ;;  %s647_s14 = smov 0  }
   0x8 LB: > { %s390_s15 = sadd.s32 4294967295, %s613_s14   ;;  %s391_s16 = sadd.s32 4294967294, %s613_s14   ;;  %s613_s14 = sphi %s647_s14, %s22_s14   ;;  %s609_s13 = sphi %s645_s13, %s846_s13   ;;  %s605_s12 = sphi %s643_s12, %s845_s12   ;;  %s601_s11 = sphi %s641_s11, %s844_s11   ;;  %s597_s10 = sphi %s639_s10, %s843_s10   ;;  %s593_s9 = sphi %s637_s9, %s842_s9  }
   0x9   : > { %s34_s17 = sadd.s32 1, %s609_s13  ;;  %s43_s18 = sadd.s32 1, %s601_s11 }
   0xa   : > { %p36_p0 = scmp.ge.s32.totalorder %s34_s17, 2  ;;  %p50_p1 = scmp.ne.s32.totalorder %s601_s11, %s597_s10 }
   0xb   : > { %p51_p2 = scmp.eq.s32.totalorder %s613_s14, 0  ;;  %p56_p3 = scmp.ne.s32.totalorder %s597_s10, %s593_s9 }
   0xc   : > { %s848_s17 = smov (%p36_p0, %s34_s17), 0  ;;  %p57_p5 = scmp.eq.s32.totalorder %s390_s15, 0 }
   0xd   : > { %p678_p4 = por %p51_p2, %p50_p1  ;;  %s39_s20 = ssub.s32 %s609_s13, %s848_s17 }
   0xe   : > { %p80_p6 = scmp.eq.s32.totalorder %s390_s15, 1  ;;  %p41_p7 = scmp.eq.s32.totalorder %s39_s20, 0 }
   0xf   : > { %p684_p8 = por %p57_p5, %p56_p3  ;;  %p86_p10 = scmp.eq.s32.totalorder %s391_s16, 1 }
  0x10   : > { %p688_p9 = por %p80_p6, %p50_p1  ;;  %p419_p13 = scmp.lt.s32.totalorder %s613_s14, 2 }
  0x11   : > { %s693_s23 = scalar_select %p41_p7, %s601_s11, %s43_s18  }
  0x12   : > { %p695_p11 = por %p86_p10, %p56_p3  ;;  %s132_s25 = sand.u32 1, %s601_s11  }
  0x13   : > { %s394_s26 = sshll.u32 %s132_s25, 6  ;;  %s395_s27 = sshll.u32 %s609_s13, 7 }
  0x14   : > { %s144_s30 = scalar_lea.hbm %s833_s0, %s395_s27  ;;  %s136_s3 = scalar_lea.vmem [#allocation2], %s394_s26 }
  0x15   : > { %s145_s4 = sshll.u32 %s136_s3, 4  ;;  %p708_p0 = pnand %p419_p13, %p678_p4  ;;  %s146_s4 = int_to_ptr.vmem [resolvable:$true] %s145_s4 }
  0x16   : > { %s133_s6 = scalar_lea.sflag [#allocation3], %s132_s25  ;;  %s488_s7 = scalar_lea.vmem %s146_s4, 1024 }
  0x17   : > { %p477_p1 = pneg %p708_p0  ;;  %p489_p2 = scmp.ne.s32.totalorder %s146_s4, %s488_s7 }
  0x18   : > { %s615_s8 = smov [#allocation2]  }
  0x19   : > { %p491_p3 = pnand %p489_p2, %p477_p1  ;;  %s493_s15 = sshll.u32 %s615_s8, 4  ;;  %s494_s15 = int_to_ptr.vmem [resolvable:$false] %s493_s15 }
  0x1a   : > { %s495_s16 = scalar_lea.vmem %s494_s15, 2048  ;;  %p496_p6 = scmp.lt.s32.totalorder %s146_s4, %s494_s15 }
  0x1b   : > { %p492_p5 = pneg %p491_p3  ;;  %p497_p7 = scmp.lt.s32.totalorder %s495_s16, %s488_s7 }
  0x1d   : > { %p498_p10 = por %p497_p7, %p496_p6 }
  0x1f   : > { %p499_p12 = pnand %p498_p10, %p492_p5 }
  0x21   : > { %502 = shalt.err (!%p499_p12)
}
  0x22   : > { %s616_s18 = smov 256   ;;  %s617_s19 = smov 128  }
  0x23   : > { %s618_s20 = smov 8   ;;  %p396_p4 = scmp.ge.s32.totalorder %s613_s14, 1 }
  0x24   : > { %411 = dma.hbm_to_vmem [thread:$0]  (!%p708_p0), %s144_s30, 1024, %s146_s4, %s133_s6, %s616_s18, %s617_s19, %s618_s20  }
  0x25   : > { %p153_p13 = scmp.lt.s32.totalorder %s613_s14, 3 }
  0x27   : > { %p154_p1 = pnand %p396_p4, %p153_p13 }
  0x28   : > { %s719_s25 = sand.u32 (!%p154_p1), 1, %s597_s10  }
  0x29   : > { %157 = sbr.rel (%p154_p1) target bundleno = 133 (0x85), region = 24  ;;  %s397_s26 = sshll.u32 (!%p154_p1), %s719_s25, 6 }
  0x2a   : > { %s160_s27 = scalar_lea.sflag (!%p154_p1), [#allocation3], %s719_s25  ;;  %s723_s28 = scalar_lea.vmem (!%p154_p1), [#allocation2], %s397_s26 }
  0x2e   : > { %580 = dma.done.wait (%p684_p8), %s160_s27, 1024  }
  0x2f   : > { %582 = vsyncadd (%p684_p8), %s160_s27, 4294966272  ;;  %s730_s29 = scalar_lea.vmem [#allocation5], %s719_s25  ;;  %v619_v0 = vmov 0.0   ;;  %s734_s30 = scalar_lea.vmem [#allocation6], %s719_s25  ;;  %v194_v1 = vld [vmem:[%s723_s28] sm:$0xff]  ;;  %v195_v2 = vld [vmem:[%s723_s28 + $0x8] sm:$0xff] }
  0x30   : > { %192 = vst [vmem:[%s730_s29] sm:$0x1] %v619_v0  ;;  %193 = vst [vmem:[%s734_s30] sm:$0x1] %v619_v0  ;;  %v196_v3 = vld [vmem:[%s723_s28 + $0x10] sm:$0xff]  ;;  %v203_v4 = vadd.f32 %v195_v2, %v194_v1  ;;  %v219_v5 = vmul.f32 %v194_v1, %v194_v1  ;;  %v220_v6 = vmul.f32 %v195_v2, %v195_v2  ;;  %v197_v8 = vld [vmem:[%s723_s28 + $0x18] sm:$0xff]  ;;  %s398_s21 = sshll.u32 %s605_s12, 4  ;;  %s273_s3 = sshll.u32 %s730_s29, 4  ;;  %s759_s3 = int_to_ptr.vmem [resolvable:$true] %s273_s3 }
  0x31   : > { %v221_v7 = vmul.f32 %v196_v3, %v196_v3  ;;  %v222_v10 = vmul.f32 %v197_v8, %v197_v8  ;;  %v198_v12 = vld [vmem:[%s723_s28 + $0x20] sm:$0xff]  ;;  %v199_v16 = vld [vmem:[%s723_s28 + $0x28] sm:$0xff]  ;;  %v200_v20 = vld [vmem:[%s723_s28 + $0x30] sm:$0xff]  ;;  %s757_s6 = scalar_lea.hbm %s834_s1, %s398_s21  ;;  %s257_s7 = scalar_lea.sflag [#allocation4], %s719_s25 }
  0x32   : > { %v204_v9 = vadd.f32 %v203_v4, %v196_v3  ;;  %v227_v11 = vadd.f32 %v220_v6, %v219_v5  ;;  %v223_v14 = vmul.f32 %v198_v12, %v198_v12  ;;  %v224_v18 = vmul.f32 %v199_v16, %v199_v16  ;;  %v201_v24 = vld [vmem:[%s723_s28 + $0x38] sm:$0xff]  ;;  %s503_s8 = scalar_lea.vmem %s759_s3, 16  ;;  %s620_s15 = smov [#allocation5]  }
  0x33   : > { %v225_v22 = vmul.f32 %v200_v20, %v200_v20  ;;  %v226_v26 = vmul.f32 %v201_v24, %v201_v24  ;;  %p504_p8 = scmp.ne.s32.totalorder %s759_s3, %s503_s8  ;;  %s507_s16 = sshll.u32 %s620_s15, 4  ;;  %s508_s16 = int_to_ptr.vmem [resolvable:$false] %s507_s16 }
  0x34   : > { %v205_v13 = vadd.f32 %v204_v9, %v197_v8  ;;  %v228_v15 = vadd.f32 %v227_v11, %v221_v7  ;;  %s509_s18 = scalar_lea.vmem %s508_s16, 32  ;;  %p510_p2 = scmp.lt.s32.totalorder %s759_s3, %s508_s16 }
  0x35   : > { %p505_p12 = pnand %p504_p8, %p688_p9  ;;  %p511_p3 = scmp.lt.s32.totalorder %s509_s18, %s503_s8 }
  0x36   : > { %v206_v17 = vadd.f32 %v205_v13, %v198_v12  ;;  %v229_v19 = vadd.f32 %v228_v15, %v222_v10 }
  0x37   : > { %v202_v40 = vld [vmem:[%s730_s29] sm:$0x1]  ;;  %p506_p0 = pneg %p505_p12  ;;  %p512_p5 = por %p511_p3, %p510_p2 }
  0x38   : > { %v207_v21 = vadd.f32 %v206_v17, %v199_v16  ;;  %v230_v23 = vadd.f32 %v229_v19, %v223_v14  ;;  %v218_v43 = vld [vmem:[%s734_s30] sm:$0x1] }
  0x39   : > { %p513_p6 = pnand %p512_p5, %p506_p0 }
  0x3a   : > { %v208_v25 = vadd.f32 %v207_v21, %v200_v20  ;;  %v231_v27 = vadd.f32 %v230_v23, %v224_v18 }
  0x3c   : > { %v209_v28 = vadd.f32 %v208_v25, %v201_v24  ;;  %v232_v29 = vadd.f32 %v231_v27, %v225_v22 }
  0x3e   : > { %v210_v30 = vrot.slane %v209_v28, 4  ;;  %v233_v31 = vadd.f32 %v232_v29, %v226_v26 }
  0x40   : > { %v211_v32 = vadd.f32 %v210_v30, %v209_v28  ;;  %v234_v33 = vrot.slane %v233_v31, 4 }
  0x42   : > { %v212_v34 = vrot.slane %v211_v32, 2  ;;  %v235_v35 = vadd.f32 %v234_v33, %v233_v31 }
  0x44   : > { %v213_v36 = vadd.f32 %v212_v34, %v211_v32  ;;  %v236_v37 = vrot.slane %v235_v35, 2 }
  0x46   : > { %v214_v38 = vrot.slane %v213_v36, 1  ;;  %v237_v39 = vadd.f32 %v236_v37, %v235_v35 }
  0x48   : > { %v215_v41 = vadd.f32 %v214_v38, %v213_v36  ;;  %v238_v42 = vrot.slane %v237_v39, 1 }
  0x4a   : > { %v216_v44 = vadd.f32 %v215_v41, %v202_v40  ;;  %v239_v45 = vadd.f32 %v238_v42, %v237_v39 }
  0x4c   : > { %217 = vst [vmem:[%s730_s29] sm:$0x1] %v216_v44  ;;  %v240_v46 = vadd.f32 %v239_v45, %v218_v43 }
  0x4e   : > { %241 = vst [vmem:[%s734_s30] sm:$0x1] %v240_v46 }
  0x53   : > { %v245_v47 = vld [vmem:[%s730_s29] sm:$0x1] }
  0x54   : > { %v246_v48 = vmul.f32 0.015625, %v245_v47 }
  0x55   : > { %v247_v50 = vld [vmem:[%s734_s30] sm:$0x1] }
  0x56   : > { %v248_v49 = vmul.f32 %v246_v48, %v246_v48  ;;  %255 = vst [vmem:[%s730_s29] sm:$0x1] %v246_v48 }
  0x57   : > { %516 = shalt.err (!%p513_p6)
}
  0x58   : > { %s517_s19 = scalar_lea.hbm %s757_s6, 16  ;;  %s521_s27 = scalar_lea.hbm %s834_s1, 32 }
  0x59   : > { %p518_p7 = scmp.ne.s32.totalorder %s757_s6, %s517_s19  ;;  %p522_p13 = scmp.lt.s32.totalorder %s757_s6, %s834_s1 }
  0x5a   : > { %p523_p1 = scmp.lt.s32.totalorder %s521_s27, %s517_s19 }
  0x5b   : > { %p519_p10 = pnand %p518_p7, %p688_p9 }
  0x5c   : > { %p524_p8 = por %p523_p1, %p522_p13 }
  0x5d   : > { %p520_p4 = pneg %p519_p10 }
  0x5f   : > { %p525_p12 = pnand %p524_p8, %p520_p4 }
  0x61   : > { %528 = shalt.err (!%p525_p12)
}
  0x62   : > { %404 = dma.vmem_to_hbm [thread:$0]  (%p688_p9), %s759_s3, 16, %s757_s6, %s257_s7   ;;  %v249_v51 = vmul.f32 64.0, %v248_v49 }
  0x63   : > { %s286_s4 = sshll.u32 %s734_s30, 4  ;;  %s790_s15 = scalar_lea.hbm %s835_s2, %s398_s21  ;;  %s287_s4 = int_to_ptr.vmem [resolvable:$true] %s286_s4 }
  0x64   : > { %v250_v52 = vsub.f32 %v247_v50, %v249_v51  ;;  %s261_s16 = scalar_lea.sflag [#allocation7], %s719_s25  ;;  %s529_s18 = scalar_lea.vmem %s287_s4, 16 }
  0x65   : > { %p530_p0 = scmp.ne.s32.totalorder %s287_s4, %s529_s18  ;;  %s621_s3 = smov [#allocation6]  }
  0x66   : > { %v251_v53 = vmul.f32 0.015873017, %v250_v52  ;;  %s533_s6 = sshll.u32 %s621_s3, 4  ;;  %s534_s6 = int_to_ptr.vmem [resolvable:$false] %s533_s6 }
  0x67   : > { %p531_p2 = pnand %p530_p0, %p688_p9  ;;  %s535_s7 = scalar_lea.vmem %s534_s6, 32 }
  0x68   : > { %v252_v54 = vmax.f32 %v251_v53, 0.0  ;;  %p536_p5 = scmp.lt.s32.totalorder %s287_s4, %s534_s6  ;;  %p537_p6 = scmp.lt.s32.totalorder %s535_s7, %s529_s18 }
  0x69   : > { %p532_p3 = pneg %p531_p2 }
  0x6a   : > { %473 = vrsqrt.f32 %v252_v54  ;;  %p538_p7 = por %p537_p6, %p536_p5 }
  0x6c   : > { %p539_p10 = pnand %p538_p7, %p532_p3 }
  0x77   : > { %v474_v55 = vpop.eup %473 }
  0x78   : > { %254 = vst [vmem:[%s734_s30] sm:$0x1] %v474_v55 }
  0x79   : > { %542 = shalt.err (!%p539_p10)
}
  0x7a   : > { %s543_s12 = scalar_lea.hbm %s790_s15, 16  ;;  %s547_s21 = scalar_lea.hbm %s835_s2, 32 }
  0x7b   : > { %p544_p4 = scmp.ne.s32.totalorder %s790_s15, %s543_s12  ;;  %p548_p8 = scmp.lt.s32.totalorder %s790_s15, %s835_s2 }
  0x7c   : > { %p549_p12 = scmp.lt.s32.totalorder %s547_s21, %s543_s12 }
  0x7d   : > { %p545_p13 = pnand %p544_p4, %p688_p9 }
  0x7e   : > { %p550_p0 = por %p549_p12, %p548_p8 }
  0x7f   : > { %p546_p1 = pneg %p545_p13 }
  0x81   : > { %p551_p2 = pnand %p550_p0, %p546_p1 }
  0x83   : > { %554 = shalt.err (!%p551_p2)
}
  0x84   : > { %405 = dma.vmem_to_hbm [thread:$0]  (%p688_p9), %s287_s4, 16, %s790_s15, %s261_s16  }
  0x85 PF: > { %s298_s26 = sand.u32 1, %s593_s9   ;;  %p841_p3 = scmp.ge.s32.totalorder %s613_s14, 2 }
  0x86   : > { %s299_s27 = scalar_lea.sflag [#allocation4], %s298_s26 }
  0x87   : > { %p413_p5 = pnand %p841_p3, %p695_p11 }
  0x89   : > { %p414_p6 = pneg %p413_p5 }
  0x8b   : > { %584 = dma.done.wait (%p414_p6), %s299_s27, 16  }
  0x8c   : > { %586 = vsyncadd (%p414_p6), %s299_s27, 4294967280  ;;  %s307_s28 = scalar_lea.sflag [#allocation7], %s298_s26 }
  0x8d   : > { %588 = dma.done.wait (%p414_p6), %s307_s28, 16  }
  0x8e   : > { %590 = vsyncadd (%p414_p6), %s307_s28, 4294967280  ;;  %s22_s14 = sadd.s32 1, %s613_s14   ;;  %s842_s9 = smov %s597_s10 }
  0x8f   : > { %p19_p7 = scmp.ge.s32.totalorder %s22_s14, 4   ;;  %s843_s10 = smov %s601_s11 }
  0x90   : > { %s844_s11 = smov %s693_s23  ;;  %s845_s12 = smov %s609_s13 }
  0x91   : > { %s846_s13 = smov %s848_s17  ;;  %21 = sbr.rel (!%p19_p7) target bundleno = 8 (0x8), region = 94 }
  0x96   :  { %311 = vsyncpa [#allocation3], 1 }
  0x97   :  { %313 = vsyncpa [#allocation3 + $0x1], 1 }
  0x98   :  { %314 = vsyncpa [#allocation4], 1 }
  0x99   :  { %316 = vsyncpa [#allocation4 + $0x1], 1 }
  0x9a   :  { %317 = vsyncpa [#allocation7], 1 }
  0x9b   :  { %319 = vsyncpa [#allocation7 + $0x1], 1 }

</bundles_post_ra>
